<compile_context>
chip_gen: v7x
topology: tpu7x:2x2x1
jax: 0.10.0
libtpu: 0.0.40
codegen_flags: <defaults>
</compile_context>

<pallas_src>
import functools

import jax
import jax.numpy as jnp
from jax.experimental import pallas as pl
from jax.experimental.pallas import tpu as pltpu


def _dice_kernel(alpha_ref, x_ref, o_ref, *, inv_bm1):
    x = x_ref[...].astype(jnp.float32)                      # (B, tH)

    # mean over batch (dim 0)
    avg = jnp.mean(x, axis=0, keepdims=True)                # (1, tH)
    diff = x - avg

    # unbiased variance (ddof=1, torch.std default); 1/(B-1) is a constant mul
    var = jnp.sum(diff * diff, axis=0, keepdims=True) * jnp.float32(inv_bm1)

    # rsqrt on the EUP: avoids a (B, tH) vector divide on the VPU
    inv_std = jax.lax.rsqrt(var)                            # (1, tH)

    # eps placement matches the module: sigmoid(norm_x + 1e-8)
    z = diff * inv_std + jnp.float32(1e-8)
    # sigmoid(z) == 0.5 * tanh(0.5 * z) + 0.5  -> tanh on the EUP slot,
    # no stable-sigmoid compare/select on the VALU.
    p = 0.5 * jnp.tanh(0.5 * z) + 0.5

    alpha = alpha_ref[0]                                    # scalar parameter
    one_minus_alpha = 1.0 - alpha                           # hoisted scalar
    # x*p + alpha*x*(1-p) == x * (alpha + (1 - alpha) * p)
    o_ref[...] = (x * (alpha + one_minus_alpha * p)).astype(o_ref.dtype)


def _round_up(x, m):
    return ((x + m - 1) // m) * m


def _pick_tile_h(B, H, in_bytes, out_bytes, budget_bytes):
    """Feature-tile width: lane-dense, VMEM-budgeted, >=2 blocks when possible."""
    if H <= 128:
        return H  # single full-extent block (block dims == array dims)
    # Double-buffered in + out blocks: 2 * B * tH * (in + out) bytes <= budget.
    per_col = 2 * B * (in_bytes + out_bytes)
    t = (budget_bytes // max(per_col, 1)) // 128 * 128
    t = max(128, min(2048, t))
    # Ensure >= 2 grid blocks so the "parallel" axis engages both v7x TCs.
    t = min(t, max(128, _round_up(-(-H // 2), 128)))
    # Never exceed H rounded up to a lane group.
    t = min(t, _round_up(H, 128))
    return t


def dice(x, alpha, *, tile_h=None, vmem_budget_bytes=16 * 1024 * 1024):
    """x: (B, H) float array, alpha: (1,) float32 parameter."""
    B, H = x.shape
    in_bytes = x.dtype.itemsize
    out_bytes = x.dtype.itemsize

    tH = tile_h if tile_h is not None else _pick_tile_h(
        B, H, in_bytes, out_bytes, vmem_budget_bytes)
    grid_h = pl.cdiv(H, tH)

    # B == 1 -> unbiased std is NaN, same as torch.std(dim=0) on one sample.
    inv_bm1 = (1.0 / (B - 1)) if B > 1 else float("nan")
    kernel = functools.partial(_dice_kernel, inv_bm1=inv_bm1)

    # Explicit scoped-VMEM limit covering the double-buffered in+out blocks
    # plus headroom (v5e default is only 16 MiB, v6e 32 MiB; v7x physical 64).
    dbuf_bytes = 2 * B * tH * (in_bytes + out_bytes)
    vmem_limit = int(min(40 << 20, max(16 << 20, 2 * dbuf_bytes + (4 << 20))))

    cost = pl.CostEstimate(
        flops=10 * B * H,
        transcendentals=B * H + H,                 # tanh per element + rsqrt per col
        bytes_accessed=B * H * (in_bytes + out_bytes) + 4)

    return pl.pallas_call(
        kernel,
        out_shape=jax.ShapeDtypeStruct((B, H), x.dtype),
        grid_spec=pltpu.PrefetchScalarGridSpec(
            num_scalar_prefetch=0,
            grid=(grid_h,),
            in_specs=[
                pl.BlockSpec(memory_space=pltpu.SMEM),        # alpha scalar
                pl.BlockSpec((B, tH), lambda j: (0, j)),      # x feature tile
            ],
            out_specs=pl.BlockSpec((B, tH), lambda j: (0, j)),
        ),
        compiler_params=pltpu.CompilerParams(
            dimension_semantics=("parallel",),                # megacore on v7x
            vmem_limit_bytes=vmem_limit),
        cost_estimate=cost,
    )(alpha, x)


def dice_ref(x, alpha):
    """Pure-JAX reference mirroring the PyTorch forward."""
    avg = jnp.mean(x, axis=0)
    std = jnp.std(x, axis=0, ddof=1)
    norm_x = (x - avg) / std
    p = jax.nn.sigmoid(norm_x + 1e-08)
    return x * p + alpha * (x * (1.0 - p))


if __name__ == "__main__":
    key = jax.random.PRNGKey(0)

    # Parameter init exactly as in the module: alpha = zeros((1,))
    alpha = jnp.zeros((1,), dtype=jnp.float32)

    # Primary small shape implied by the module (single full-extent block).
    B, H = 8, 32
    x = jax.random.normal(key, (B, H), dtype=jnp.float32)
    out = jax.block_until_ready(dice(x, alpha))
    ref = dice_ref(x, alpha[0])
    assert out.shape == x.shape and out.dtype == x.dtype
    assert jnp.allclose(out, ref, atol=1e-5, rtol=1e-5), "mismatch vs reference"

    # Ragged multi-tile path: H=300 with tH=128 -> 3 blocks, last one partial
    # (masked output store, no wrapper pad/slice).
    x2 = jax.random.normal(jax.random.PRNGKey(1), (8, 300), dtype=jnp.float32)
    out2 = jax.block_until_ready(dice(x2, alpha, tile_h=128))
    ref2 = dice_ref(x2, alpha[0])
    assert out2.shape == x2.shape
    assert jnp.allclose(out2, ref2, atol=1e-5, rtol=1e-5), "mismatch (ragged tiles)"

    # Auto tile selection path (>= 2 blocks: tH=256 for H=300).
    out3 = jax.block_until_ready(dice(x2, alpha))
    assert jnp.allclose(out3, ref2, atol=1e-5, rtol=1e-5), "mismatch (auto tile)"

    print("KERNEL_OK")
</pallas_src>

<mosaic_0001>
module attributes {stable_mosaic.version = 11 : i64} {
  func.func @_dice_kernel(%arg0: i32, %arg1: memref<1xf32, #tpu.memory_space<smem>>, %arg2: memref<8x32xf32, #tpu.memory_space<vmem>>, %arg3: memref<8x32xf32, #tpu.memory_space<vmem>>) attributes {dimension_semantics = [#tpu.dimension_semantics<parallel>], iteration_bounds = array<i64: 1>, scalar_prefetch = 0 : i64, scratch_operands = 0 : i64, tpu.core_type = #tpu.core_type<tc>, window_params = [{transform_indices = @transform_0, window_bounds = array<i64: 1>}, {transform_indices = @transform_1, window_bounds = array<i64: 8, 32>}, {transform_indices = @transform_2, window_bounds = array<i64: 8, 32>}]} {
    %c0 = arith.constant 0 : index
    %c0_0 = arith.constant 0 : index
    %0 = vector.load %arg2[%c0, %c0_0] : memref<8x32xf32, #tpu.memory_space<vmem>>, vector<8x32xf32>
    %cst = arith.constant dense<0.000000e+00> : vector<32xf32>
    %1 = vector.multi_reduction <add>, %0, %cst [0] : vector<8x32xf32> to vector<32xf32>
    %2 = vector.shape_cast %1 : vector<32xf32> to vector<1x32xf32>
    %cst_1 = arith.constant 8.000000e+00 : f32
    %3 = vector.broadcast %cst_1 : f32 to vector<1x32xf32>
    %4 = arith.divf %2, %3 : vector<1x32xf32>
    %5 = vector.broadcast %4 : vector<1x32xf32> to vector<8x32xf32>
    %6 = arith.subf %0, %5 : vector<8x32xf32>
    %7 = arith.mulf %6, %6 : vector<8x32xf32>
    %cst_2 = arith.constant dense<0.000000e+00> : vector<32xf32>
    %8 = vector.multi_reduction <add>, %7, %cst_2 [0] : vector<8x32xf32> to vector<32xf32>
    %9 = vector.shape_cast %8 : vector<32xf32> to vector<1x32xf32>
    %cst_3 = arith.constant 0.142857149 : f32
    %10 = vector.broadcast %cst_3 : f32 to vector<1x32xf32>
    %11 = arith.mulf %9, %10 : vector<1x32xf32>
    %12 = math.rsqrt %11 : vector<1x32xf32>
    %13 = vector.broadcast %12 : vector<1x32xf32> to vector<8x32xf32>
    %14 = arith.mulf %6, %13 : vector<8x32xf32>
    %cst_4 = arith.constant 9.99999993E-9 : f32
    %15 = vector.broadcast %cst_4 : f32 to vector<8x32xf32>
    %16 = arith.addf %14, %15 : vector<8x32xf32>
    %cst_5 = arith.constant 5.000000e-01 : f32
    %17 = vector.broadcast %cst_5 : f32 to vector<8x32xf32>
    %18 = arith.mulf %17, %16 : vector<8x32xf32>
    %19 = math.tanh %18 : vector<8x32xf32>
    %cst_6 = arith.constant 5.000000e-01 : f32
    %20 = vector.broadcast %cst_6 : f32 to vector<8x32xf32>
    %21 = arith.mulf %20, %19 : vector<8x32xf32>
    %cst_7 = arith.constant 5.000000e-01 : f32
    %22 = vector.broadcast %cst_7 : f32 to vector<8x32xf32>
    %23 = arith.addf %21, %22 : vector<8x32xf32>
    %c0_8 = arith.constant 0 : index
    %24 = memref.load %arg1[%c0_8] : memref<1xf32, #tpu.memory_space<smem>>
    %cst_9 = arith.constant 1.000000e+00 : f32
    %25 = arith.subf %cst_9, %24 : f32
    %26 = vector.broadcast %25 : f32 to vector<8x32xf32>
    %27 = arith.mulf %26, %23 : vector<8x32xf32>
    %28 = vector.broadcast %24 : f32 to vector<8x32xf32>
    %29 = arith.addf %28, %27 : vector<8x32xf32>
    %30 = arith.mulf %0, %29 : vector<8x32xf32>
    %c0_10 = arith.constant 0 : index
    %c0_11 = arith.constant 0 : index
    %31 = vector.load %arg3[%c0_10, %c0_11] : memref<8x32xf32, #tpu.memory_space<vmem>>, vector<8x32xf32>
    tpu.vector_store %arg3[%c0_10, %c0_11], %30 {strides = array<i32>} : memref<8x32xf32, #tpu.memory_space<vmem>>, vector<8x32xf32>,
    return
  }
  func.func @transform_0(%arg0: i32) -> i32 {
    %c0_i32 = arith.constant 0 : i32
    %c0_i32_0 = arith.constant 0 : i32
    return %c0_i32 : i32
  }
  func.func @transform_1(%arg0: i32) -> (i32, i32) {
    %c0_i32 = arith.constant 0 : i32
    %c0_i32_0 = arith.constant 0 : i32
    return %c0_i32, %arg0 : i32, i32
  }
  func.func @transform_2(%arg0: i32) -> (i32, i32) {
    %c0_i32 = arith.constant 0 : i32
    %c0_i32_0 = arith.constant 0 : i32
    return %c0_i32, %arg0 : i32, i32
  }
}

</mosaic_0001>

<bundles_post_ra>
// kernel: tpu_custom_call.1
= control target key start
LH: loop header
LB: loop body
LE: loop exit
PB: predicated region body
PF: predicated region fallthrough
CT: control target
= control target key end

     0   :  { %8 = vsyncpa [#allocation4], 0  ;;  %s180_s0 = inlined_call_operand.<no memory space> [shape: f32[1], index: 0, kind: input, shape index: {}]   ;;  %s181_s1 = inlined_call_operand.hbm [shape: f32[8,32], index: 1, kind: input, shape index: {}]   ;;  %s182_s2 = inlined_call_operand.hbm [shape: f32[8,32], index: 2, kind: output, shape index: {}]  }
   0x1   :  { %9 = vsyncpa [#allocation5], 0  ;;  %s130_s9 = smov [#allocation3]   ;;  %s82_s13 = scalar_lea.hbm %s181_s1, 128 }
   0x2   :  { %s18_s10 = sshll.u32 %s130_s9, 4  ;;  %p83_p0 = scmp.ne.s32.totalorder %s181_s1, %s82_s13  ;;  %s19_s10 = int_to_ptr.vmem [resolvable:$true] %s18_s10 }
   0x3   :  { %p86_p1 = scmp.lt.u32.totalorder %s82_s13, %s181_s1 }
   0x5   :  { %p88_p2 = pnand %p86_p1, %p83_p0 }
   0x7   :  { %91 = shalt.err (!%p88_p2)
}
   0x8   :  { %s92_s18 = scalar_lea.vmem %s19_s10, 128  ;;  %p97_p4 = scmp.lt.s32.totalorder %s19_s10, %s19_s10 }
   0x9   :  { %p93_p3 = scmp.ne.s32.totalorder %s19_s10, %s92_s18  ;;  %p98_p5 = scmp.lt.s32.totalorder %s92_s18, %s92_s18 }
   0xb   :  { %p99_p6 = por %p98_p5, %p97_p4 }
   0xd   :  { %p100_p7 = pnand %p99_p6, %p93_p3 }
   0xf   :  { %103 = shalt.err (!%p100_p7)
}
  0x10   :  { %21 = dma.hbm_to_vmem [thread:$0]  %s181_s1, 128, %s19_s10, [#allocation4]  }
  0x11   :  { %126 = dma.done.wait [#allocation4], 128  }
  0x12   :  { %127 = vsyncadd [#allocation4], 4294967168  ;;  %vm26_vm0 = vcmask 261120   ;;  %v25_v0 = vld [vmem:[#allocation3] sm:$0xff]  ;;  %s54_s22 = ssub.f32 1.0, %s180_s0  ;;  %v57_v27 = vstv %s180_s0  ;;  %s131_s25 = smov [#allocation6]  }
  0x13   :  { %v27_v1 = vsel %vm26_vm0, %v25_v0, 0.0  ;;  %s67_s26 = sshll.u32 %s131_s25, 4  ;;  %s68_s26 = int_to_ptr.vmem [resolvable:$true] %s67_s26 }
  0x14   :  { %v28_v2 = vrot.slane %v27_v1, 4  ;;  %v55_v25 = vstv %s54_s22  ;;  %s104_s27 = scalar_lea.vmem %s68_s26, 128  ;;  %p109_p9 = scmp.lt.s32.totalorder %s68_s26, %s68_s26 }
  0x15   :  { %p105_p8 = scmp.ne.s32.totalorder %s68_s26, %s104_s27  ;;  %p110_p10 = scmp.lt.s32.totalorder %s104_s27, %s104_s27 }
  0x16   :  { %v29_v3 = vadd.f32 %v28_v2, %v27_v1 }
  0x17   :  { %p111_p11 = por %p110_p10, %p109_p9 }
  0x18   :  { %v30_v4 = vrot.slane %v29_v3, 2 }
  0x19   :  { %p112_p12 = pnand %p111_p11, %p105_p8 }
  0x1a   :  { %v31_v5 = vadd.f32 %v30_v4, %v29_v3 }
  0x1c   :  { %v32_v6 = vrot.slane %v31_v5, 1 }
  0x1e   :  { %v33_v7 = vadd.f32 %v32_v6, %v31_v5 }
  0x20   :  { %v35_v8 = vmul.f32 0.125, %v33_v7 }
  0x22   :  { %v36_v9 = vsub.f32 %v25_v0, %v35_v8 }
  0x24   :  { %v37_v10 = vmul.f32 %v36_v9, %v36_v9 }
  0x26   :  { %v38_v11 = vsel %vm26_vm0, %v37_v10, 0.0 }
  0x27   :  { %v39_v12 = vrot.slane %v38_v11, 4 }
  0x29   :  { %v40_v13 = vadd.f32 %v39_v12, %v38_v11 }
  0x2b   :  { %v41_v14 = vrot.slane %v40_v13, 2 }
  0x2d   :  { %v42_v15 = vadd.f32 %v41_v14, %v40_v13 }
  0x2f   :  { %v43_v16 = vrot.slane %v42_v15, 1 }
  0x31   :  { %v44_v17 = vadd.f32 %v43_v16, %v42_v15 }
  0x33   :  { %v45_v18 = vmul.f32 0.14285715, %v44_v17 }
  0x35   :  { %78 = vrsqrt.f32 %v45_v18 }
  0x3f   :  { %v79_v19 = vpop.eup %78 }
  0x40   :  { %v47_v20 = vmul.f32 %v79_v19, %v36_v9 }
  0x42   :  { %v48_v21 = vadd.f32 1e-08, %v47_v20 }
  0x44   :  { %v49_v22 = vmul.f32 0.5, %v48_v21 }
  0x46   :  { %80 = vtanh.f32 %v49_v22 }
  0x50   :  { %v81_v23 = vpop.eup %80 }
  0x51   :  { %v51_v24 = vmul.f32 0.5, %v81_v23 }
  0x53   :  { %v52_v26 = vadd.f32 0.5, %v51_v24 }
  0x55   :  { %v56_v28 = vmul.f32 %v55_v25, %v52_v26 }
  0x57   :  { %v58_v29 = vadd.f32 %v57_v27, %v56_v28 }
  0x59   :  { %v59_v30 = vmul.f32 %v58_v29, %v25_v0 }
  0x5b   :  { %60 = vst.msk [vmem:[#allocation6] sm:$0xff] %vm26_vm0, %v59_v30 }
  0x5c   :  { %115 = shalt.err (!%p112_p12)
}
  0x5d   :  { %s116_s30 = scalar_lea.hbm %s182_s2, 128 }
  0x5e   :  { %p117_p13 = scmp.ne.s32.totalorder %s182_s2, %s116_s30  ;;  %p120_p0 = scmp.lt.u32.totalorder %s116_s30, %s182_s2 }
  0x60   :  { %p122_p1 = pnand %p120_p0, %p117_p13 }
  0x62   :  { %125 = shalt.err (!%p122_p1)
}
  0x63   :  { %70 = dma.vmem_to_hbm [thread:$0]  %s68_s26, 128, %s182_s2, [#allocation5]  }
  0x64   :  { %128 = dma.done.wait [#allocation5], 128  }
  0x65   :  { %129 = vsyncadd [#allocation5], 4294967168 }
  0x66   :  { %74 = vsyncpa [#allocation4], 1 }
  0x67   :  { %75 = vsyncpa [#allocation5], 1 }

</bundles_post_ra>
